<compile_context>
chip_gen: v5e
topology: v5e:2x2
jax: 0.10.0
libtpu: 0.0.40
codegen_flags: <defaults>
</compile_context>

<pallas_src>
import functools

import jax
import jax.numpy as jnp
from jax.experimental import pallas as pl
from jax.experimental.pallas import tpu as pltpu


def _round_up(x, m):
    return ((x + m - 1) // m) * m


@functools.lru_cache(maxsize=None)
def _vmem_budget_bytes():
    """Scoped-VMEM budget: ~half of physical VMEM (32 MiB v7x, 64 MiB v5e/v6e)."""
    cap = 64 * 1024 * 1024          # conservative default (= v7x physical VMEM)
    try:
        info = pltpu.get_tpu_info()
        cap = int(getattr(info, "vmem_capacity_bytes", cap)) or cap
    except Exception:               # CPU interpret / older-API fallback
        pass
    return max(cap // 2, 16 * 1024 * 1024)


def _pick_tile(hw, cin, cmid, nclass, *, training, x_bytes, w_bytes, budget,
               max_tm=16384):
    """Largest multiple-of-128 pixel tile that fits the per-generation VMEM budget."""
    per_pix = 2 * cin * x_bytes                   # double-buffered x block
    if training:
        per_pix += 2 * 4                          # double-buffered int32 labels
    else:
        per_pix += 2 * nclass * 2                 # double-buffered bf16 prob output
    per_pix += 4 * (3 * cmid + 4 * nclass)        # f32 temporaries staged in VMEM
    fixed = 2 * w_bytes * (cmid * cin + cmid + nclass * cmid + nclass)  # 2x weight bufs
    fixed += 2 * 8 * 128 * 4                      # training partials block
    avail = max(int(budget * 0.75) - fixed, 128 * per_pix)   # 25% headroom
    tm = (avail // per_pix) // 128 * 128
    return int(max(128, min(tm, max_tm, _round_up(hw, 128))))


# -----------------------------------------------------------------------------
# Training-branch kernel: encoder -> decoder -> NLL loss + pixel accuracy.
# Layout: x block (1, Cin, Tm) with pixels on lanes; weights (Cout, Cin) bf16.
# Emits a lane-dense (8, 128) per-tile partials block (row0=loss, 1=correct,
# 2=valid) so the grid is fully parallel (no grid-resident accumulator).
# -----------------------------------------------------------------------------
def _seg_train_kernel(x_ref, w1_ref, b1_ref, w2_ref, b2_ref, lbl_ref, part_ref,
                      *, hw):
    x = x_ref[0].astype(w1_ref.dtype)                          # (Cin, Tm) bf16

    # encoder: 1x1 conv + ReLU (per-pixel matmul, pixels on lanes, f32 accum)
    h = jnp.dot(w1_ref[...], x, preferred_element_type=jnp.float32) + b1_ref[...]
    h = jnp.maximum(h, 0.0)                                    # (Cmid, Tm) f32

    # decoder: 1x1 conv (bf16 MXU inputs, f32 accumulation)
    logits = (jnp.dot(w2_ref[...], h.astype(w2_ref.dtype),
                      preferred_element_type=jnp.float32) + b2_ref[...])  # (K, Tm)
    nclass, tm = logits.shape

    m = jnp.max(logits, axis=0, keepdims=True)                 # (1, Tm)
    z = jnp.sum(jnp.exp(logits - m), axis=0, keepdims=True)    # (1, Tm)

    lbl = lbl_ref[0]                                           # (1, Tm) int32
    valid_b = lbl >= 0
    if hw % tm:  # ragged last tile: mask lanes past hw (static check, usually free)
        pix = (pl.program_id(1) * tm
               + jax.lax.broadcasted_iota(jnp.int32, (1, tm), 1))
        valid_b = jnp.logical_and(valid_b, pix < hw)

    # NLL(ignore_index=-1): pick logits[label] only (no full log-softmax tensor).
    cls = jax.lax.broadcasted_iota(jnp.int32, logits.shape, 0)  # (K, Tm)
    onehot = (cls == lbl).astype(jnp.float32)
    picked = jnp.sum(onehot * logits, axis=0, keepdims=True)    # (1, Tm)
    nll = jnp.where(valid_b, -(picked - m - jnp.log(z)), 0.0)

    # pixel_acc: argmax over classes (first max index, like torch.max)
    cls_f = cls.astype(jnp.float32)
    preds = jnp.min(jnp.where(logits == m, cls_f, float(nclass)),
                    axis=0, keepdims=True)                      # (1, Tm)
    correct = jnp.where(
        jnp.logical_and(valid_b, preds == lbl.astype(jnp.float32)), 1.0, 0.0)
    valid = valid_b.astype(jnp.float32)

    nll_s = jnp.sum(nll, axis=1, keepdims=True)                 # (1, 1)
    cor_s = jnp.sum(correct, axis=1, keepdims=True)
    val_s = jnp.sum(valid, axis=1, keepdims=True)

    # Lane-dense per-tile partials: row0=loss_sum, row1=correct, row2=valid.
    row = jax.lax.broadcasted_iota(jnp.int32, (8, 128), 0)
    part_ref[0, 0] = jnp.where(row == 0, nll_s,
                     jnp.where(row == 1, cor_s,
                     jnp.where(row == 2, val_s, 0.0)))


# -----------------------------------------------------------------------------
# Inference-branch kernel: encoder -> decoder -> softmax probabilities (K, Tm)
# -----------------------------------------------------------------------------
def _seg_infer_kernel(x_ref, w1_ref, b1_ref, w2_ref, b2_ref, p_ref, *, hw):
    x = x_ref[0].astype(w1_ref.dtype)                           # (Cin, Tm) bf16
    h = jnp.maximum(
        jnp.dot(w1_ref[...], x, preferred_element_type=jnp.float32) + b1_ref[...],
        0.0)
    logits = (jnp.dot(w2_ref[...], h.astype(w2_ref.dtype),
                      preferred_element_type=jnp.float32) + b2_ref[...])  # (K, Tm)
    tm = logits.shape[1]
    m = jnp.max(logits, axis=0, keepdims=True)
    e = jnp.exp(logits - m)
    inv = pl.reciprocal(jnp.sum(e, axis=0, keepdims=True), approx=True)  # EUP slot
    p = e * inv
    if hw % tm:  # zero stale lanes of the ragged last tile before the store
        pix = (pl.program_id(1) * tm
               + jax.lax.broadcasted_iota(jnp.int32, (1, tm), 1))
        p = jnp.where(pix < hw, p, 0.0)
    p_ref[0] = p.astype(p_ref.dtype)                            # lane-dense bf16 store


# -----------------------------------------------------------------------------
# Shared specs
# -----------------------------------------------------------------------------
def _weight_specs(cin, cmid, nclass, tm):
    # TODO(synk): on newer JAX, mark the constant-index weight blocks with
    # pipeline_mode=pl.Buffered(1) to drop the redundant second buffer (v7x VMEM),
    # and sweep pl.Buffered(3) on the x / output specs if DMA waits are exposed.
    return [
        pl.BlockSpec((1, cin, tm), lambda b, i: (b, 0, i)),   # x   (N, Cin, HW)
        pl.BlockSpec((cmid, cin), lambda b, i: (0, 0)),       # w1  (Cmid, Cin) bf16
        pl.BlockSpec((cmid, 1), lambda b, i: (0, 0)),         # b1  (Cmid, 1)   f32
        pl.BlockSpec((nclass, cmid), lambda b, i: (0, 0)),    # w2  (K, Cmid)   bf16
        pl.BlockSpec((nclass, 1), lambda b, i: (0, 0)),       # b2  (K, 1)      f32
    ]


# -----------------------------------------------------------------------------
# Wrappers
# -----------------------------------------------------------------------------
def seg_train_forward(img_nchw, label_nhw, params, *, tm=None,
                      compute_dtype=jnp.bfloat16):
    """Returns (loss, acc) exactly like SegmentationModule.forward(segSize=None)."""
    w1, b1, w2, b2 = params                      # w1 (Cmid,Cin), w2 (K,Cmid)
    n, cin, h, w = img_nchw.shape
    cmid, nclass = w1.shape[0], w2.shape[0]
    hw = h * w
    budget = _vmem_budget_bytes()
    if tm is None:
        tm = _pick_tile(hw, cin, cmid, nclass, training=True,
                        x_bytes=img_nchw.dtype.itemsize,
                        w_bytes=jnp.dtype(compute_dtype).itemsize,
                        budget=budget)

    x = img_nchw.reshape(n, cin, hw)                         # pure reshape, no transpose
    lbl = label_nhw.reshape(n, 1, hw).astype(jnp.int32)      # lane-dense labels
    w1c = w1.astype(compute_dtype)
    w2c = w2.astype(compute_dtype)
    b1f = b1.astype(jnp.float32)
    b2f = b2.astype(jnp.float32)

    num_tiles = (hw + tm - 1) // tm
    kernel = functools.partial(_seg_train_kernel, hw=hw)

    m_pix = n * hw
    cost = pl.CostEstimate(
        flops=2 * m_pix * (cin * cmid + cmid * nclass),
        transcendentals=m_pix * (nclass + 1),
        bytes_accessed=(x.size * x.dtype.itemsize + lbl.size * 4
                        + (w1c.size + w2c.size) * 2 + (b1.size + b2.size) * 4
                        + n * num_tiles * 8 * 128 * 4),
    )

    partials = pl.pallas_call(
        kernel,
        out_shape=jax.ShapeDtypeStruct((n, num_tiles, 8, 128), jnp.float32),
        grid_spec=pltpu.PrefetchScalarGridSpec(
            num_scalar_prefetch=0,
            grid=(n, num_tiles),
            in_specs=_weight_specs(cin, cmid, nclass, tm) + [
                pl.BlockSpec((1, 1, tm), lambda b, i: (b, 0, i)),   # labels
            ],
            out_specs=pl.BlockSpec((1, 1, 8, 128), lambda b, i: (b, i, 0, 0)),
        ),
        compiler_params=pltpu.CompilerParams(
            dimension_semantics=("parallel", "parallel"),
            vmem_limit_bytes=budget),
        cost_estimate=cost,
    )(x, w1c, b1f, w2c, b2f, lbl)

    # Reduce tiny per-tile partials in plain JAX: row0=loss_sum, row1=correct, row2=valid.
    stats = jnp.sum(partials[:, :, :3, 0], axis=(0, 1))      # (3,)
    # NLLLoss(reduction='mean', ignore_index=-1): average over non-ignored pixels
    loss = stats[0] / stats[2]
    # pixel_acc (torch adds 1e-10 to the denominator)
    acc = stats[1] / (stats[2] + 1e-10)
    return loss, acc


def seg_infer_forward(img_nchw, params, segSize, *, tm=None,
                      compute_dtype=jnp.bfloat16):
    """Returns pred probs at segSize, like SegmentationModule.forward(segSize=...)."""
    w1, b1, w2, b2 = params
    n, cin, h, w = img_nchw.shape
    cmid, nclass = w1.shape[0], w2.shape[0]
    hw = h * w
    budget = _vmem_budget_bytes()
    if tm is None:
        tm = _pick_tile(hw, cin, cmid, nclass, training=False,
                        x_bytes=img_nchw.dtype.itemsize,
                        w_bytes=jnp.dtype(compute_dtype).itemsize,
                        budget=budget)

    x = img_nchw.reshape(n, cin, hw)
    w1c = w1.astype(compute_dtype)
    w2c = w2.astype(compute_dtype)
    b1f = b1.astype(jnp.float32)
    b2f = b2.astype(jnp.float32)

    num_tiles = (hw + tm - 1) // tm
    kernel = functools.partial(_seg_infer_kernel, hw=hw)

    m_pix = n * hw
    cost = pl.CostEstimate(
        flops=2 * m_pix * (cin * cmid + cmid * nclass),
        transcendentals=m_pix * (nclass + 1),
        bytes_accessed=(x.size * x.dtype.itemsize
                        + (w1c.size + w2c.size) * 2 + (b1.size + b2.size) * 4
                        + m_pix * nclass * 2),
    )

    probs = pl.pallas_call(
        kernel,
        out_shape=jax.ShapeDtypeStruct((n, nclass, hw), jnp.bfloat16),
        grid_spec=pltpu.PrefetchScalarGridSpec(
            num_scalar_prefetch=0,
            grid=(n, num_tiles),
            in_specs=_weight_specs(cin, cmid, nclass, tm),
            out_specs=pl.BlockSpec((1, nclass, tm), lambda b, i: (b, 0, i)),
        ),
        compiler_params=pltpu.CompilerParams(
            dimension_semantics=("parallel", "parallel"),
            vmem_limit_bytes=budget),
        cost_estimate=cost,
    )(x, w1c, b1f, w2c, b2f)

    probs = probs.astype(jnp.float32).reshape(n, nclass, h, w)  # already NCHW order
    # TODO(synk): bilinear upsample (F.interpolate) kept in plain JAX (glue).
    return jax.image.resize(probs, (n, nclass, segSize[0], segSize[1]),
                            method="bilinear")


class SegmentationModulePallas:
    """Mirrors SegmentationModule.forward with a synthetic encoder/decoder/crit."""

    def __init__(self, params, deep_sup_scale=None, compute_dtype=jnp.bfloat16):
        self.params = params
        self.compute_dtype = compute_dtype
        # TODO(synk): deep_sup_scale path (second decoder head) not implemented.
        self.deep_sup_scale = deep_sup_scale

    def __call__(self, feed_dict, *, segSize=None):
        if segSize is None:
            return seg_train_forward(feed_dict["img_data"], feed_dict["seg_label"],
                                     self.params, compute_dtype=self.compute_dtype)
        return seg_infer_forward(feed_dict["img_data"], self.params, segSize,
                                 compute_dtype=self.compute_dtype)


# -----------------------------------------------------------------------------
# Pure-JAX references (mirror the kernel's mixed-precision policy:
# bf16 MXU inputs, f32 accumulation, f32 elementwise math).
# -----------------------------------------------------------------------------
def _ref_logits(img, params, compute_dtype=jnp.bfloat16):
    w1, b1, w2, b2 = params
    n, cin, h, w = img.shape
    x = img.reshape(n, cin, h * w).astype(compute_dtype)
    hid = jnp.einsum("mc,ncp->nmp", w1.astype(compute_dtype), x,
                     preferred_element_type=jnp.float32) + b1[None]
    hid = jnp.maximum(hid, 0.0)
    logits = jnp.einsum("km,nmp->nkp", w2.astype(compute_dtype),
                        hid.astype(compute_dtype),
                        preferred_element_type=jnp.float32) + b2[None]
    return logits                                             # (N, K, HW) f32


def _ref_train(img, lbl, params, compute_dtype=jnp.bfloat16):
    logits = _ref_logits(img, params, compute_dtype)
    k = logits.shape[1]
    logits2 = jnp.transpose(logits, (0, 2, 1)).reshape(-1, k)
    logp = jax.nn.log_softmax(logits2, axis=-1)
    l = lbl.reshape(-1)
    valid = l >= 0
    safe = jnp.where(valid, l, 0)
    nll = -jnp.take_along_axis(logp, safe[:, None], axis=-1)[:, 0]
    loss = jnp.sum(jnp.where(valid, nll, 0.0)) / jnp.sum(valid)
    preds = jnp.argmax(logits2, axis=-1)
    acc = jnp.sum(valid & (preds == l)) / (jnp.sum(valid) + 1e-10)
    return loss, acc


def _ref_infer(img, params, seg_size, compute_dtype=jnp.bfloat16):
    n, cin, h, w = img.shape
    logits = _ref_logits(img, params, compute_dtype)
    probs = jax.nn.softmax(logits, axis=1).reshape(n, -1, h, w)
    return jax.image.resize(probs, (n, probs.shape[1], seg_size[0], seg_size[1]),
                            method="bilinear")


# -----------------------------------------------------------------------------
# Main
# -----------------------------------------------------------------------------
if __name__ == "__main__":
    N, Cin, H, W = 2, 4, 16, 16
    Cmid, NCLASS = 32, 8

    key = jax.random.PRNGKey(0)
    k_img, k_lbl, k1, k2, k3, k4 = jax.random.split(key, 6)

    img = jax.random.normal(k_img, (N, Cin, H, W), dtype=jnp.float32)
    # labels in [-1, NCLASS-1]; -1 == ignore_index
    label = jax.random.randint(k_lbl, (N, H, W), -1, NCLASS, dtype=jnp.int32)

    # Weights in PyTorch 1x1-conv layout (Cout, Cin): kernels compute Wt @ X directly.
    w1 = 0.1 * jax.random.normal(k1, (Cmid, Cin), dtype=jnp.float32)
    b1 = 0.1 * jax.random.normal(k2, (Cmid, 1), dtype=jnp.float32)
    w2 = 0.1 * jax.random.normal(k3, (NCLASS, Cmid), dtype=jnp.float32)
    b2 = 0.1 * jax.random.normal(k4, (NCLASS, 1), dtype=jnp.float32)
    params = (w1, b1, w2, b2)

    module = SegmentationModulePallas(params, deep_sup_scale=None)
    feed_dict = {"img_data": img, "seg_label": label}

    # Training branch: (loss, acc)
    loss, acc = module(feed_dict, segSize=None)
    jax.block_until_ready((loss, acc))

    # Inference branch: prediction probabilities at segSize
    pred = module(feed_dict, segSize=(32, 32))
    jax.block_until_ready(pred)

    # Sanity checks against pure-JAX references (same mixed-precision policy).
    ref_loss, ref_acc = _ref_train(img, label, params)
    ref_pred = _ref_infer(img, params, (32, 32))
    assert jnp.allclose(loss, ref_loss, rtol=1e-4, atol=1e-4), (loss, ref_loss)
    assert jnp.allclose(acc, ref_acc, rtol=1e-3, atol=3e-3), (acc, ref_acc)
    assert pred.shape == (N, NCLASS, 32, 32)
    assert jnp.allclose(pred, ref_pred, rtol=1e-2, atol=1e-2), float(
        jnp.max(jnp.abs(pred - ref_pred)))

    print("KERNEL_OK")
</pallas_src>

<mosaic_0001>
module attributes {stable_mosaic.version = 11 : i64} {
  func.func @_seg_train_kernel(%arg0: i32, %arg1: i32, %arg2: memref<1x4x256xf32, #tpu.memory_space<vmem>>, %arg3: memref<32x4xbf16, #tpu.memory_space<vmem>>, %arg4: memref<32x1xf32, #tpu.memory_space<vmem>>, %arg5: memref<8x32xbf16, #tpu.memory_space<vmem>>, %arg6: memref<8x1xf32, #tpu.memory_space<vmem>>, %arg7: memref<1x1x256xi32, #tpu.memory_space<vmem>>, %arg8: memref<1x1x8x128xf32, #tpu.memory_space<vmem>>) attributes {dimension_semantics = [#tpu.dimension_semantics<parallel>, #tpu.dimension_semantics<parallel>], iteration_bounds = array<i64: 2, 1>, scalar_prefetch = 0 : i64, scratch_operands = 0 : i64, tpu.core_type = #tpu.core_type<tc>, window_params = [{transform_indices = @transform_0, window_bounds = array<i64: 1, 4, 256>}, {pipeline_mode = #tpu.pipeline_mode<synchronous>, transform_indices = @transform_1, window_bounds = array<i64: 32, 4>}, {pipeline_mode = #tpu.pipeline_mode<synchronous>, transform_indices = @transform_2, window_bounds = array<i64: 32, 1>}, {pipeline_mode = #tpu.pipeline_mode<synchronous>, transform_indices = @transform_3, window_bounds = array<i64: 8, 32>}, {pipeline_mode = #tpu.pipeline_mode<synchronous>, transform_indices = @transform_4, window_bounds = array<i64: 8, 1>}, {transform_indices = @transform_5, window_bounds = array<i64: 1, 1, 256>}, {transform_indices = @transform_6, window_bounds = array<i64: 1, 1, 8, 128>}]} {
    %c0 = arith.constant 0 : index
    %c0_0 = arith.constant 0 : index
    %c0_1 = arith.constant 0 : index
    %0 = vector.load %arg2[%c0, %c0_0, %c0_1] : memref<1x4x256xf32, #tpu.memory_space<vmem>>, vector<1x4x256xf32>
    %1 = vector.shape_cast %0 : vector<1x4x256xf32> to vector<4x256xf32>
    %2 = arith.truncf %1 : vector<4x256xf32> to vector<4x256xbf16>
    %c0_2 = arith.constant 0 : index
    %c0_3 = arith.constant 0 : index
    %3 = vector.load %arg3[%c0_2, %c0_3] : memref<32x4xbf16, #tpu.memory_space<vmem>>, vector<32x4xbf16>
    %cst = arith.constant dense<0.000000e+00> : vector<32x256xf32>
    %4 = tpu.matmul %3, %2, %cst {dimension_numbers = #tpu.dot_dimension_numbers<[1], [0], [0], [1], [0, 0, 1, 1], [], []>} : vector<32x4xbf16>, vector<4x256xbf16>, vector<32x256xf32> -> vector<32x256xf32>
    %c0_4 = arith.constant 0 : index
    %c0_5 = arith.constant 0 : index
    %5 = vector.load %arg4[%c0_4, %c0_5] : memref<32x1xf32, #tpu.memory_space<vmem>>, vector<32x1xf32>
    %6 = vector.broadcast %5 : vector<32x1xf32> to vector<32x256xf32>
    %7 = arith.addf %4, %6 : vector<32x256xf32>
    %cst_6 = arith.constant 0.000000e+00 : f32
    %8 = vector.broadcast %cst_6 : f32 to vector<32x256xf32>
    %9 = arith.maximumf %7, %8 : vector<32x256xf32>
    %c0_7 = arith.constant 0 : index
    %c0_8 = arith.constant 0 : index
    %10 = vector.load %arg5[%c0_7, %c0_8] : memref<8x32xbf16, #tpu.memory_space<vmem>>, vector<8x32xbf16>
    %11 = arith.truncf %9 : vector<32x256xf32> to vector<32x256xbf16>
    %cst_9 = arith.constant dense<0.000000e+00> : vector<8x256xf32>
    %12 = tpu.matmul %10, %11, %cst_9 {dimension_numbers = #tpu.dot_dimension_numbers<[1], [0], [0], [1], [0, 0, 1, 1], [], []>} : vector<8x32xbf16>, vector<32x256xbf16>, vector<8x256xf32> -> vector<8x256xf32>
    %c0_10 = arith.constant 0 : index
    %c0_11 = arith.constant 0 : index
    %13 = vector.load %arg6[%c0_10, %c0_11] : memref<8x1xf32, #tpu.memory_space<vmem>>, vector<8x1xf32>
    %14 = vector.broadcast %13 : vector<8x1xf32> to vector<8x256xf32>
    %15 = arith.addf %12, %14 : vector<8x256xf32>
    %cst_12 = arith.constant dense<0xFF800000> : vector<256xf32>
    %16 = vector.multi_reduction <maximumf>, %15, %cst_12 [0] : vector<8x256xf32> to vector<256xf32>
    %17 = vector.shape_cast %16 : vector<256xf32> to vector<1x256xf32>
    %18 = vector.broadcast %17 : vector<1x256xf32> to vector<8x256xf32>
    %19 = arith.subf %15, %18 : vector<8x256xf32>
    %20 = math.exp %19 : vector<8x256xf32>
    %cst_13 = arith.constant dense<0.000000e+00> : vector<256xf32>
    %21 = vector.multi_reduction <add>, %20, %cst_13 [0] : vector<8x256xf32> to vector<256xf32>
    %22 = vector.shape_cast %21 : vector<256xf32> to vector<1x256xf32>
    %c0_14 = arith.constant 0 : index
    %c0_15 = arith.constant 0 : index
    %c0_16 = arith.constant 0 : index
    %23 = vector.load %arg7[%c0_14, %c0_15, %c0_16] : memref<1x1x256xi32, #tpu.memory_space<vmem>>, vector<1x1x256xi32>
    %24 = vector.shape_cast %23 : vector<1x1x256xi32> to vector<1x256xi32>
    %c0_i32 = arith.constant 0 : i32
    %25 = vector.broadcast %c0_i32 : i32 to vector<1x256xi32>
    %26 = arith.cmpi sge, %24, %25 : vector<1x256xi32>
    %27 = tpu.iota {dimensions = array<i32: 0>} : vector<8x256xi32>
    %28 = vector.broadcast %24 : vector<1x256xi32> to vector<8x256xi32>
    %29 = arith.cmpi eq, %27, %28 : vector<8x256xi32>
    %30 = arith.extui %29 : vector<8x256xi1> to vector<8x256xi32>
    %31 = arith.sitofp %30 : vector<8x256xi32> to vector<8x256xf32>
    %32 = arith.mulf %31, %15 : vector<8x256xf32>
    %cst_17 = arith.constant dense<0.000000e+00> : vector<256xf32>
    %33 = vector.multi_reduction <add>, %32, %cst_17 [0] : vector<8x256xf32> to vector<256xf32>
    %34 = vector.shape_cast %33 : vector<256xf32> to vector<1x256xf32>
    %35 = arith.subf %34, %17 : vector<1x256xf32>
    %36 = math.log %22 : vector<1x256xf32>
    %37 = arith.subf %35, %36 : vector<1x256xf32>
    %cst_18 = arith.constant 0.000000e+00 : f32
    %38 = vector.broadcast %cst_18 : f32 to vector<1x256xf32>
    %39 = arith.subf %38, %37 : vector<1x256xf32>
    %cst_19 = arith.constant 0.000000e+00 : f32
    %40 = vector.broadcast %cst_19 : f32 to vector<1x256xf32>
    %41 = arith.select %26, %39, %40 : vector<1x256xi1>, vector<1x256xf32>
    %42 = arith.sitofp %27 : vector<8x256xi32> to vector<8x256xf32>
    %43 = vector.broadcast %17 : vector<1x256xf32> to vector<8x256xf32>
    %44 = arith.cmpf oeq, %15, %43 : vector<8x256xf32>
    %cst_20 = arith.constant 8.000000e+00 : f32
    %45 = vector.broadcast %cst_20 : f32 to vector<8x256xf32>
    %46 = arith.select %44, %42, %45 : vector<8x256xi1>, vector<8x256xf32>
    %cst_21 = arith.constant dense<0x7F800000> : vector<256xf32>
    %47 = vector.multi_reduction <minimumf>, %46, %cst_21 [0] : vector<8x256xf32> to vector<256xf32>
    %48 = vector.shape_cast %47 : vector<256xf32> to vector<1x256xf32>
    %49 = arith.sitofp %24 : vector<1x256xi32> to vector<1x256xf32>
    %50 = arith.cmpf oeq, %48, %49 : vector<1x256xf32>
    %51 = arith.andi %26, %50 : vector<1x256xi1>
    %cst_22 = arith.constant 1.000000e+00 : f32
    %cst_23 = arith.constant 0.000000e+00 : f32
    %52 = vector.broadcast %cst_22 : f32 to vector<1x256xf32>
    %53 = vector.broadcast %cst_23 : f32 to vector<1x256xf32>
    %54 = arith.select %51, %52, %53 : vector<1x256xi1>, vector<1x256xf32>
    %55 = arith.extui %26 : vector<1x256xi1> to vector<1x256xi32>
    %56 = arith.sitofp %55 : vector<1x256xi32> to vector<1x256xf32>
    %cst_24 = arith.constant dense<0.000000e+00> : vector<1xf32>
    %57 = vector.multi_reduction <add>, %41, %cst_24 [1] : vector<1x256xf32> to vector<1xf32>
    %58 = vector.shape_cast %57 : vector<1xf32> to vector<1x1xf32>
    %cst_25 = arith.constant dense<0.000000e+00> : vector<1xf32>
    %59 = vector.multi_reduction <add>, %54, %cst_25 [1] : vector<1x256xf32> to vector<1xf32>
    %60 = vector.shape_cast %59 : vector<1xf32> to vector<1x1xf32>
    %cst_26 = arith.constant dense<0.000000e+00> : vector<1xf32>
    %61 = vector.multi_reduction <add>, %56, %cst_26 [1] : vector<1x256xf32> to vector<1xf32>
    %62 = vector.shape_cast %61 : vector<1xf32> to vector<1x1xf32>
    %63 = tpu.iota {dimensions = array<i32: 0>} : vector<8x128xi32>
    %c0_i32_27 = arith.constant 0 : i32
    %64 = vector.broadcast %c0_i32_27 : i32 to vector<8x128xi32>
    %65 = arith.cmpi eq, %63, %64 : vector<8x128xi32>
    %c1_i32 = arith.constant 1 : i32
    %66 = vector.broadcast %c1_i32 : i32 to vector<8x128xi32>
    %67 = arith.cmpi eq, %63, %66 : vector<8x128xi32>
    %c2_i32 = arith.constant 2 : i32
    %68 = vector.broadcast %c2_i32 : i32 to vector<8x128xi32>
    %69 = arith.cmpi eq, %63, %68 : vector<8x128xi32>
    %cst_28 = arith.constant 0.000000e+00 : f32
    %70 = vector.shape_cast %62 : vector<1x1xf32> to vector<1x1xf32>
    %71 = vector.broadcast %70 : vector<1x1xf32> to vector<8x128xf32>
    %72 = vector.broadcast %cst_28 : f32 to vector<8x128xf32>
    %73 = arith.select %69, %71, %72 : vector<8x128xi1>, vector<8x128xf32>
    %74 = vector.shape_cast %60 : vector<1x1xf32> to vector<1x1xf32>
    %75 = vector.broadcast %74 : vector<1x1xf32> to vector<8x128xf32>
    %76 = arith.select %67, %75, %73 : vector<8x128xi1>, vector<8x128xf32>
    %77 = vector.shape_cast %58 : vector<1x1xf32> to vector<1x1xf32>
    %78 = vector.broadcast %77 : vector<1x1xf32> to vector<8x128xf32>
    %79 = arith.select %65, %78, %76 : vector<8x128xi1>, vector<8x128xf32>
    %c0_29 = arith.constant 0 : index
    %c0_30 = arith.constant 0 : index
    %c0_31 = arith.constant 0 : index
    %c0_32 = arith.constant 0 : index
    %80 = vector.load %arg8[%c0_29, %c0_30, %c0_31, %c0_32] : memref<1x1x8x128xf32, #tpu.memory_space<vmem>>, vector<1x1x8x128xf32>
    %81 = vector.shape_cast %80 : vector<1x1x8x128xf32> to vector<8x128xf32>
    %82 = vector.shape_cast %79 : vector<8x128xf32> to vector<1x1x8x128xf32>
    tpu.vector_store %arg8[%c0_29, %c0_30, %c0_31, %c0_32], %82 {strides = array<i32>} : memref<1x1x8x128xf32, #tpu.memory_space<vmem>>, vector<1x1x8x128xf32>,
    return
  }
  func.func @transform_0(%arg0: i32, %arg1: i32) -> (i32, i32, i32) {
    %c0_i32 = arith.constant 0 : i32
    %c0_i32_0 = arith.constant 0 : i32
    return %arg0, %c0_i32, %arg1 : i32, i32, i32
  }
  func.func @transform_1(%arg0: i32, %arg1: i32) -> (i32, i32) {
    %c0_i32 = arith.constant 0 : i32
    %c0_i32_0 = arith.constant 0 : i32
    %c0_i32_1 = arith.constant 0 : i32
    return %c0_i32, %c0_i32_0 : i32, i32
  }
  func.func @transform_2(%arg0: i32, %arg1: i32) -> (i32, i32) {
    %c0_i32 = arith.constant 0 : i32
    %c0_i32_0 = arith.constant 0 : i32
    %c0_i32_1 = arith.constant 0 : i32
    return %c0_i32, %c0_i32_0 : i32, i32
  }
  func.func @transform_3(%arg0: i32, %arg1: i32) -> (i32, i32) {
    %c0_i32 = arith.constant 0 : i32
    %c0_i32_0 = arith.constant 0 : i32
    %c0_i32_1 = arith.constant 0 : i32
    return %c0_i32, %c0_i32_0 : i32, i32
  }
  func.func @transform_4(%arg0: i32, %arg1: i32) -> (i32, i32) {
    %c0_i32 = arith.constant 0 : i32
    %c0_i32_0 = arith.constant 0 : i32
    %c0_i32_1 = arith.constant 0 : i32
    return %c0_i32, %c0_i32_0 : i32, i32
  }
  func.func @transform_5(%arg0: i32, %arg1: i32) -> (i32, i32, i32) {
    %c0_i32 = arith.constant 0 : i32
    %c0_i32_0 = arith.constant 0 : i32
    return %arg0, %c0_i32, %arg1 : i32, i32, i32
  }
  func.func @transform_6(%arg0: i32, %arg1: i32) -> (i32, i32, i32, i32) {
    %c0_i32 = arith.constant 0 : i32
    %c0_i32_0 = arith.constant 0 : i32
    %c0_i32_1 = arith.constant 0 : i32
    return %arg0, %arg1, %c0_i32, %c0_i32_0 : i32, i32, i32, i32
  }
}

</mosaic_0001>

<bundles_post_ra>
// kernel: tpu_custom_call.1
= control target key start
LH: loop header
LB: loop body
LE: loop exit
PB: predicated region body
PF: predicated region fallthrough
CT: control target
= control target key end

     0   :  { %11 = vsyncpa [#allocation3], 0  ;;  %s1108_s0 = inlined_call_operand.vmem [shape: f32[2,4,256], index: 0, kind: input, shape index: {}]   ;;  %s1109_s1 = inlined_call_operand.vmem [shape: bf16[32,4], index: 1, kind: input, shape index: {}]   ;;  %s1110_s2 = inlined_call_operand.vmem [shape: f32[32,1], index: 2, kind: input, shape index: {}]   ;;  %s1111_s3 = inlined_call_operand.vmem [shape: bf16[8,32], index: 3, kind: input, shape index: {}]   ;;  %s1112_s4 = inlined_call_operand.vmem [shape: f32[8,1], index: 4, kind: input, shape index: {}]   ;;  %s1113_s5 = inlined_call_operand.vmem [shape: s32[2,1,256], index: 5, kind: input, shape index: {}]   ;;  %s1114_s6 = inlined_call_operand.hbm [shape: f32[2,1,8,128], index: 6, kind: output, shape index: {}]  }
   0x1   :  { %13 = vsyncpa [#allocation3 + $0x1], 0  ;;  %s933_s21 = smov 0   ;;  %s935_s22 = smov 0  }
   0x2   :  { %s937_s23 = smov 0   ;;  %s939_s24 = smov 0  }
   0x3   :  { %s941_s25 = smov 0   ;;  %s943_s26 = smov 0  }
   0x4 LB: > { %s715_s27 = sadd.s32 4294967295, %s894_s26   ;;  %s716_s28 = sadd.s32 4294967294, %s894_s26   ;;  %s894_s26 = sphi %s943_s26, %s19_s26   ;;  %s890_s25 = sphi %s941_s25, %s1121_s25   ;;  %s886_s24 = sphi %s939_s24, %s1120_s24   ;;  %s882_s23 = sphi %s937_s23, %s1119_s23   ;;  %s878_s22 = sphi %s935_s22, %s1118_s22   ;;  %s874_s21 = sphi %s933_s21, %s1117_s21  }
   0x5   : > { %s31_s29 = sadd.s32 1, %s890_s25  ;;  %s180_s30 = sadd.s32 1, %s882_s23 }
   0x6   : > { %p33_p0 = scmp.ge.s32.totalorder %s31_s29, 2  ;;  %p190_p1 = scmp.ne.s32.totalorder %s882_s23, %s878_s22 }
   0x7   : > { %p191_p2 = scmp.eq.s32.totalorder %s715_s27, 1  ;;  %p196_p3 = scmp.ne.s32.totalorder %s878_s22, %s874_s21 }
   0x8   : > { %s1123_s29 = smov (%p33_p0, %s31_s29), 0  ;;  %p197_p5 = scmp.eq.s32.totalorder %s716_s28, 1 }
   0x9   : > { %p973_p4 = por %p191_p2, %p190_p1  ;;  %s175_s8 = ssub.s32 %s890_s25, %s1123_s29 }
   0xa   : > { %p719_p6 = scmp.ge.s32.totalorder %s894_s26, 1  ;;  %p178_p7 = scmp.eq.s32.totalorder %s175_s8, 0 }
   0xb   : > { %p980_p8 = por %p197_p5, %p196_p3  ;;  %p252_p9 = scmp.lt.s32.totalorder %s894_s26, 3 }
   0xc   : > { %s986_s10 = scalar_select %p178_p7, %s882_s23, %s180_s30  }
   0xd   : > { %p253_p10 = pnand %p719_p6, %p252_p9 }
   0xe   : > { %p295_p11 = scmp.lt.s32.totalorder (!%p253_p10), %s886_s24, 1  ;;  %s742_s8 = sshll.u32 (!%p253_p10), %s886_s24, 3 }
   0xf   : > { %256 = sbr.rel (%p253_p10) target bundleno = 516 (0x204), region = 44 }
  0x14   : > { %v327_v0 = vld [vmem:[%s1110_s2] sm:$0xff]  ;;  %v896_v1 = vmov 0   ;;  %s995_s13 = scalar_select %p295_p11, %s886_s24, 1  ;;  %v329_v2 = vld [vmem:[%s1110_s2 + $0x10] sm:$0xff]  ;;  %v328_v4 = vld [vmem:[%s1110_s2 + $0x8] sm:$0xff]  ;;  %vm368_vm0 = vcmask 1041408   ;;  %v494_v61 = vlaneseq }
  0x15   : > { %806 = vset.pattern.permute.xlu1 %v896_v1  ;;  %805 = vset.pattern.permute.xlu0 %v896_v1  ;;  %v330_v5 = vld [vmem:[%s1110_s2 + $0x18] sm:$0xff]  ;;  %v746_v12 = vld [vmem:[%s1109_s1] sm:$0xff]  ;;  %vm361_vm1 = vcmask 31744   ;;  %v747_v13 = vld [vmem:[%s1109_s1 + $0x8] sm:$0xff]  ;;  %vm432_vm2 = vcmask 261120   ;;  %v897_v49 = vmov 0.0  }
  0x16   : > { %333 = vperm.xlu1 %806, %v327_v0   ;;  %807 = vset.pattern.permute.xlu2 %v896_v1  ;;  %s745_s14 = sshll.u32 %s995_s13, 3  ;;  %v426_v16 = vld [vmem:[%s1112_s4] sm:$0xff]  ;;  %s723_s19 = sshll.u32 %s995_s13, 1  ;;  %vm531_vm4 = vcmask 1040384  }
  0x17   : > { %s302_s17 = scalar_lea.vmem %s1108_s0, %s745_s14  ;;  %343 = vperm.xlu0 %805, %v329_v2   ;;  %429 = vperm.xlu2 %807, %v426_v16   ;;  %v421_v47 = vld [vmem:[%s1111_s3] sm:$0xf]  ;;  %s311_s28 = scalar_lea.vmem %s1113_s5, %s723_s19 }
  0x18   : > { %v314_v3 = vld [vmem:[%s302_s17] sm:$0xff]  ;;  %s291_s13 = sand.u32 1, %s878_s22   ;;  %s621_s14 = scalar_lea.hbm %s1114_s6, %s742_s8 }
  0x19   : > { %316 = vst [vmem:[#allocation1] ss:$2 sm:$0xff] %v314_v3  ;;  %v1027_v48 = vld [vmem:[%s311_s28] sm:$0x3]  ;;  %v1035_v3 = vshrl.u32 %v494_v61, 7  ;;  %s720_s30 = sshll.u32 %s291_s13, 3 }
  0x1a   : > { %vm493_vm3 = vcmp.ge.s32.totalorder %v1027_v48, 0  ;;  %s293_s15 = scalar_lea.vmem [#allocation2], %s720_s30  ;;  %s625_s17 = sshll.u32 %s621_s14, 4  ;;  %s626_s17 = int_to_ptr.hbm [resolvable:$true] %s625_s17 }
  0x1b   : > { %v740_v50 = vsel %vm493_vm3, 1.0, %v897_v49  ;;  %vm601_vm13 = vcmp.eq.s32.totalorder %v1035_v3, 2  ;;  %vm600_vm14 = vcmp.eq.s32.totalorder %v1035_v3, 1  ;;  %s623_s16 = sshll.u32 %s293_s15, 4  ;;  %vm599_vm15 = vcmp.eq.s32.totalorder %v1035_v3, 0  ;;  %s610_s24 = scalar_lea.sflag [#allocation3], %s291_s13  ;;  %s624_s16 = int_to_ptr.vmem [resolvable:$true] %s623_s16 }
  0x1c   : > { %v590_v51 = vperm.slane %v740_v50, 0  ;;  %v591_v52 = vperm.slane %v740_v50, 1  ;;  %s830_s18 = sshra.s32 %s626_s17, 4  ;;  %s836_s28 = scalar_lea.hbm %s1114_s6, 16  ;;  %s831_s18 = int_to_ptr.hbm [resolvable:$true] %s830_s18 }
  0x1d   : > { %s832_s19 = scalar_lea.hbm %s831_s18, 8  ;;  %p837_p1 = scmp.lt.s32.totalorder %s831_s18, %s1114_s6 }
  0x1e   : > { %338 = vperm.xlu1 %806, %v328_v4   ;;  %v594_v54 = vsel %vm531_vm4, %v590_v51, 0.0  ;;  %v595_v55 = vsel %vm531_vm4, %v591_v52, 0.0  ;;  %p833_p12 = scmp.ne.s32.totalorder %s831_s18, %s832_s19  ;;  %p838_p2 = scmp.lt.s32.totalorder %s836_s28, %s832_s19 }
  0x1f   : > { %348 = vperm.xlu0 %805, %v330_v5   ;;  %v596_v58 = vadd.f32 %v595_v55, %v594_v54 }
  0x20   : > { %v317_v6 = vld.sshfl [vmem:[#allocation1] sm:$0xff pattern:$0x75316420]  ;;  %v318_v7 = vld.sshfl [vmem:[#allocation1 + $0x8] sm:$0xff pattern:$0x75316420]  ;;  %p834_p13 = pnand %p833_p12, %p973_p4  ;;  %p839_p3 = por %p838_p2, %p837_p1 }
  0x21   : > { %v321_v8 = vpack.c.bf16 %v317_v6, %v317_v6  ;;  %v322_v9 = vpack.c.bf16 %v318_v7, %v318_v7  ;;  %v496_v6 = vperm.slane %v1027_v48, 0  ;;  %v497_v7 = vperm.slane %v1027_v48, 1 }
  0x22   : > { %p835_p0 = pneg %p834_p13 }
  0x23   : > { %v370_v10 = vsel %vm368_vm0, %v321_v8, 0  ;;  %v373_v11 = vsel %vm368_vm0, %v322_v9, 0  ;;  %vm498_vm5 = vcmp.eq.s32.totalorder %v1035_v3, %v496_v6  ;;  %vm499_vm6 = vcmp.eq.s32.totalorder %v1035_v3, %v497_v7 }
  0x24   : > { %382 = vmatpush.bf16.msra.mxu0 %v370_v10  ;;  %401 = vmatpush.bf16.msra.mxu1 %v373_v11  ;;  %p840_p5 = pnand %p839_p3, %p835_p0 }
  0x27   : > { %732 = vmatmul.msk.bf16.vlgmr.msra.gmra.mxu0 %vm361_vm1, %v746_v12  ;;  %734 = vmatmul.msk.bf16.vlgmr.msra.gmra.mxu1 %vm361_vm1, %v746_v12 }
  0x37   : > { %733 = vmatmul.msk.bf16.gmra.mxu0 %vm361_vm1, %v747_v13  ;;  %735 = vmatmul.msk.bf16.gmra.mxu1 %vm361_vm1, %v747_v13 }
  0x40   : > { %597 = vadd.xlane.f32.xlu2 %v596_v58 }
  0x71   : > { %v430_v53 = vpop.permute.xlu2 %429 }
  0x88   : > { %v334_v19 = vpop.permute.xlu1 %333 }
  0x89   : > { %v344_v20 = vpop.permute.xlu0 %343 }
  0x90   : > { %v339_v23 = vpop.permute.xlu1 %338 }
  0x91   : > { %v349_v24 = vpop.permute.xlu0 %348 }
  0xa4   : > { %v384_v14 = vpop.f32.mrf.mxu0  ;;  %v403_v15 = vpop.f32.mrf.mxu1 }
  0xa5   : > { %v385_v33 = vadd.f32 %v384_v14, %v334_v19  ;;  %v404_v34 = vadd.f32 %v403_v15, %v334_v19  ;;  %v535_v14 = vcvt.s32.f32 %v1035_v3 }
  0xa7   : > { %v413_v43 = vmax.f32 %v385_v33, 0.0  ;;  %v414_v44 = vmax.f32 %v404_v34, 0.0  ;;  %v552_v33 = vcvt.s32.f32 %v1027_v48 }
  0xac   : > { %v386_v17 = vpop.f32.mrf.mxu0  ;;  %v405_v18 = vpop.f32.mrf.mxu1 }
  0xad   : > { %v387_v29 = vadd.f32 %v386_v17, %v339_v23  ;;  %v406_v30 = vadd.f32 %v405_v18, %v339_v23  ;;  %v738_v17 = vsel %vm498_vm5, 1.0, %v897_v49  ;;  %v739_v18 = vsel %vm499_vm6, 1.0, %v897_v49 }
  0xaf   : > { %v415_v39 = vmax.f32 %v387_v29, 0.0  ;;  %v416_v40 = vmax.f32 %v406_v30, 0.0 }
  0xb1   : > { %v422_v45 = vpack.c.bf16 %v415_v39, %v413_v43  ;;  %v423_v46 = vpack.c.bf16 %v416_v40, %v414_v44 }
  0xb4   : > { %v389_v21 = vpop.f32.mrf.mxu0  ;;  %v408_v22 = vpop.f32.mrf.mxu1 }
  0xb5   : > { %v390_v25 = vadd.f32 %v389_v21, %v344_v20  ;;  %v409_v26 = vadd.f32 %v408_v22, %v344_v20 }
  0xb7   : > { %v417_v35 = vmax.f32 %v390_v25, 0.0  ;;  %v418_v36 = vmax.f32 %v409_v26, 0.0 }
  0xbc   : > { %v391_v27 = vpop.f32.mrf.mxu0  ;;  %v410_v28 = vpop.f32.mrf.mxu1 }
  0xbd   : > { %v392_v31 = vadd.f32 %v391_v27, %v349_v24  ;;  %v411_v32 = vadd.f32 %v410_v28, %v349_v24 }
  0xbf   : > { %v419_v37 = vmax.f32 %v392_v31, 0.0  ;;  %v420_v38 = vmax.f32 %v411_v32, 0.0 }
  0xc1   : > { %v424_v41 = vpack.c.bf16 %v419_v37, %v417_v35  ;;  %v425_v42 = vpack.c.bf16 %v420_v38, %v418_v36 }
  0xc3   : > { %442 = vmatpush.bf16.msra.mxu2 %v424_v41  ;;  %455 = vmatpush.bf16.msra.mxu3 %v425_v42  ;;  %v554_v41 = vperm.slane %v552_v33, 0  ;;  %v555_v42 = vperm.slane %v552_v33, 1 }
  0xc7   : > { %443 = vmatpush.bf16.msra.mxu2 %v422_v45  ;;  %456 = vmatpush.bf16.msra.mxu3 %v423_v46 }
  0xca   : > { %736 = vmatmul.msk.bf16.vlgmr.msra.gmra.mxu2 %vm432_vm2, %v421_v47  ;;  %737 = vmatmul.msk.bf16.vlgmr.msra.gmra.mxu3 %vm432_vm2, %v421_v47 }
 0x14d   : > { %v445_v56 = vpop.f32.mrf.mxu2  ;;  %v458_v57 = vpop.f32.mrf.mxu3 }
 0x14e   : > { %v446_v59 = vadd.f32 %v445_v56, %v430_v53  ;;  %v459_v60 = vadd.f32 %v458_v57, %v430_v53 }
 0x150   : > { %v462_v62 = vrot.slane %v446_v59, 4  ;;  %v468_v63 = vrot.slane %v459_v60, 4  ;;  %v504_v27 = vmul.f32 %v738_v17, %v446_v59  ;;  %v505_v28 = vmul.f32 %v739_v18, %v459_v60 }
 0x152   : > { %v463_v0 = vmax.f32 %v446_v59, %v462_v62  ;;  %v469_v2 = vmax.f32 %v459_v60, %v468_v63  ;;  %v506_v34 = vrot.slane %v504_v27, 4  ;;  %v512_v35 = vrot.slane %v505_v28, 4 }
 0x154   : > { %v464_v4 = vrot.slane %v463_v0, 2  ;;  %v470_v5 = vrot.slane %v469_v2, 2  ;;  %v507_v45 = vadd.f32 %v506_v34, %v504_v27  ;;  %v513_v46 = vadd.f32 %v512_v35, %v505_v28 }
 0x155   : > { %v447_v8 = vpop.f32.mrf.mxu2  ;;  %v460_v9 = vpop.f32.mrf.mxu3 }
 0x156   : > { %v465_v10 = vmax.f32 %v463_v0, %v464_v4  ;;  %v471_v11 = vmax.f32 %v469_v2, %v470_v5  ;;  %v508_v54 = vrot.slane %v507_v45, 2  ;;  %v514_v55 = vrot.slane %v513_v46, 2 }
 0x158   : > { %v466_v12 = vrot.slane %v465_v10, 1  ;;  %v472_v13 = vrot.slane %v471_v11, 1  ;;  %v509_v2 = vadd.f32 %v508_v54, %v507_v45  ;;  %v515_v4 = vadd.f32 %v514_v55, %v513_v46 }
 0x15a   : > { %v1042_v15 = vmax.f32 %v465_v10, %v466_v12  ;;  %v1044_v16 = vmax.f32 %v471_v11, %v472_v13  ;;  %v510_v11 = vrot.slane %v509_v2, 1 }
 0x15c   : > { %v474_v19 = vsub.f32 %v446_v59, %v1042_v15  ;;  %vm536_vm7 = vcmp.eq.f32.partialorder %v446_v59, %v1042_v15  ;;  %v475_v20 = vsub.f32 %v459_v60, %v1044_v16  ;;  %vm537_vm8 = vcmp.eq.f32.partialorder %v459_v60, %v1044_v16 }
 0x15d   : > { %v538_v21 = vsel %vm536_vm7, %v535_v14, 8.0  ;;  %v539_v22 = vsel %vm537_vm8, %v535_v14, 8.0  ;;  %v511_v17 = vadd.f32 %v510_v11, %v509_v2 }
 0x15e   : > { %v476_v23 = vmul.f32 1.442695, %v474_v19  ;;  %v540_v24 = vrot.slane %v538_v21, 4  ;;  %v478_v25 = vmul.f32 1.442695, %v475_v20  ;;  %v546_v26 = vrot.slane %v539_v22, 4 }
 0x160   : > { %808 = vpow2.f32 %v476_v23  ;;  %v541_v29 = vmin.f32 %v538_v21, %v540_v24  ;;  %v547_v30 = vmin.f32 %v539_v22, %v546_v26 }
 0x161   : > { %810 = vpow2.f32 %v478_v25 }
 0x162   : > { %v548_v31 = vrot.slane %v547_v30, 2  ;;  %v542_v32 = vrot.slane %v541_v29, 2 }
 0x164   : > { %v549_v36 = vmin.f32 %v547_v30, %v548_v31  ;;  %v543_v37 = vmin.f32 %v541_v29, %v542_v32 }
 0x166   : > { %v809_v38 = vpop.eup %808  ;;  %v544_v39 = vrot.slane %v543_v37, 1  ;;  %v550_v40 = vrot.slane %v549_v36, 1 }
 0x167   : > { %v811_v43 = vpop.eup %810  ;;  %v480_v44 = vrot.slane %v809_v38, 4 }
 0x168   : > { %v486_v47 = vrot.slane %v811_v43, 4  ;;  %v545_v50 = vmin.f32 %v543_v37, %v544_v39  ;;  %v551_v51 = vmin.f32 %v549_v36, %v550_v40 }
 0x169   : > { %v481_v52 = vadd.f32 %v809_v38, %v480_v44 }
 0x16a   : > { %vm558_vm9 = vcmp.eq.f32.partialorder %v545_v50, %v554_v41  ;;  %vm559_vm10 = vcmp.eq.f32.partialorder %v551_v51, %v555_v42  ;;  %v487_v53 = vadd.f32 %v811_v43, %v486_v47 }
 0x16b   : > { %v561_v56 = vsel %vm559_vm10, 1, %v896_v1  ;;  %v482_v57 = vrot.slane %v481_v52, 2  ;;  %v560_v60 = vsel %vm558_vm9, 1, %v896_v1  ;;  %v516_v1 = vrot.slane %v515_v4, 1 }
 0x16c   : > { %v562_v58 = vrot.slane %v561_v56, 7  ;;  %v488_v59 = vrot.slane %v487_v53, 2 }
 0x16d   : > { %v483_v61 = vadd.f32 %v482_v57, %v481_v52  ;;  %v517_v18 = vadd.f32 %v516_v1, %v515_v4 }
 0x16e   : > { %v563_v62 = vsel %vm531_vm4, %v560_v60, %v562_v58  ;;  %v489_v63 = vadd.f32 %v488_v59, %v487_v53 }
 0x16f   : > { %vm564_vm11 = vcmp.ne.s32.totalorder %v563_v62, 0  ;;  %v484_v0 = vrot.slane %v483_v61, 1  ;;  %v519_v22 = vsub.f32 %v517_v18, %v1044_v16  ;;  %v598_v16 = vpop.xlane.xlu2 %597 }
 0x170   : > { %vm565_vm12 = vmand %vm493_vm3, %vm564_vm11  ;;  %v490_v5 = vrot.slane %v489_v63, 1  ;;  %v602_v35 = vperm.slane %v598_v16, 0 }
 0x171   : > { %v566_v6 = vsel %vm565_vm12, 1.0, %v897_v49  ;;  %v485_v7 = vadd.f32 %v484_v0, %v483_v61  ;;  %v518_v49 = vsub.f32 %v511_v17, %v1042_v15 }
 0x172   : > { %v580_v8 = vperm.slane %v566_v6, 0  ;;  %v581_v9 = vperm.slane %v566_v6, 1  ;;  %v491_v10 = vadd.f32 %v490_v5, %v489_v63  ;;  %v603_v37 = vsel %vm601_vm13, %v602_v35, 0.0 }
 0x173   : > { %812 = vlog2.f32 %v485_v7 }
 0x174   : > { %v584_v12 = vsel %vm531_vm4, %v580_v8, 0.0  ;;  %v585_v13 = vsel %vm531_vm4, %v581_v9, 0.0  ;;  %814 = vlog2.f32 %v491_v10 }
 0x175   : > { %v586_v14 = vadd.f32 %v585_v13, %v584_v12 }
 0x177   : > { %587 = vadd.xlane.f32.xlu0 %v586_v14 }
 0x179   : > { %v813_v19 = vpop.eup %812 }
 0x17a   : > { %v815_v20 = vpop.eup %814  ;;  %v521_v21 = vmul.f32 0.6931472, %v813_v19 }
 0x17b   : > { %v523_v23 = vmul.f32 0.6931472, %v815_v20 }
 0x17c   : > { %v524_v24 = vsub.f32 %v518_v49, %v521_v21 }
 0x17d   : > { %v525_v25 = vsub.f32 %v519_v22, %v523_v23 }
 0x17e   : > { %v526_v27 = vsub.f32 0.0, %v524_v24 }
 0x17f   : > { %v527_v26 = vsub.f32 0.0, %v525_v25 }
 0x181   : > { %v530_v28 = vrot.slane %v527_v26, 7 }
 0x183   : > { %v532_v29 = vsel %vm531_vm4, %v526_v27, %v530_v28 }
 0x184   : > { %v534_v30 = vsel %vm493_vm3, %v532_v29, 0.0 }
 0x185   : > { %v570_v31 = vperm.slane %v534_v30, 0  ;;  %v571_v32 = vperm.slane %v534_v30, 1 }
 0x187   : > { %v574_v33 = vsel %vm531_vm4, %v570_v31, 0.0  ;;  %v575_v15 = vsel %vm531_vm4, %v571_v32, 0.0 }
 0x188   : > { %v576_v34 = vadd.f32 %v575_v15, %v574_v33 }
 0x18a   : > { %577 = vadd.xlane.f32.xlu1 %v576_v34 }
 0x1ea   : > { %v588_v36 = vpop.xlane.xlu0 %587 }
 0x1eb   : > { %v604_v48 = vperm.slane %v588_v36, 0 }
 0x1ed   : > { %v605_v40 = vsel %vm600_vm14, %v604_v48, %v603_v37 }
 0x1fd   : > { %v578_v38 = vpop.xlane.xlu1 %577 }
 0x1fe   : > { %v606_v39 = vperm.slane %v578_v38, 0 }
 0x200   : > { %v607_v41 = vsel %vm599_vm15, %v606_v39, %v605_v40 }
 0x201   : > { %608 = vst [vmem:[%s293_s15] sm:$0xff] %v607_v41 }
 0x202   : > { %843 = shalt.err (!%p840_p5)
}
 0x203   : > { %748 = dma.vmem_to_hbm [thread:$0]  (%p973_p4), %s624_s16, 128, %s626_s17, %s610_s24  }
 0x204 PF: > { %p754_p6 = scmp.ge.s32.totalorder %s894_s26, 2  ;;  %s637_s13 = sand.u32 1, %s874_s21  }
 0x205   : > { %s638_s11 = scalar_lea.sflag [#allocation3], %s637_s13 }
 0x206   : > { %p751_p7 = pnand %p754_p6, %p980_p8 }
 0x208   : > { %p752_p9 = pneg %p751_p7 }
 0x20a   : > { %869 = dma.done.wait (%p752_p9), %s638_s11, 128  }
 0x20b   : > { %871 = vsyncadd (%p752_p9), %s638_s11, 4294967168  ;;  %s19_s26 = sadd.s32 1, %s894_s26   ;;  %s1117_s21 = smov %s878_s22 }
 0x20c   : > { %p16_p10 = scmp.ge.s32.totalorder %s19_s26, 4   ;;  %s1118_s22 = smov %s882_s23 }
 0x20d   : > { %s1119_s23 = smov %s986_s10  ;;  %s1120_s24 = smov %s890_s25 }
 0x20e   : > { %s1121_s25 = smov %s1123_s29  ;;  %18 = sbr.rel (!%p16_p10) target bundleno = 4 (0x4), region = 82 }
 0x213   :  { %644 = vsyncpa [#allocation3], 1 }
 0x214   :  { %646 = vsyncpa [#allocation3 + $0x1], 1 }

</bundles_post_ra>
